<compile_context>
chip_gen: v7x
topology: tpu7x:2x2x1
jax: 0.10.0
libtpu: 0.0.40
codegen_flags: <defaults>
</compile_context>

<pallas_src>
import jax
import jax.numpy as jnp
from jax.experimental import pallas as pl
from jax.experimental.pallas import tpu as pltpu

NUM_CLASSES = 4
N_MFCC = 13
IN_DIM = 2 * N_MFCC  # 26
H1 = 64
H2 = 32

# Row offsets of each weight matrix inside the packed (128, 128) bf16 slab.
# (Rows = input features of that layer, columns = output features.)
W1_ROW = 0    # rows  0:26 (26:31 left zero for tile alignment), cols 0:64
W2_ROW = 32   # rows 32:96,  cols 0:32
W3_ROW = 96   # rows 96:128, cols 0:4

FLOPS_PER_ROW = 2 * (IN_DIM * H1 + H1 * H2 + H2 * NUM_CLASSES)  # 7680


def _round_up(n, m):
    return ((n + m - 1) // m) * m


def _cdiv(a, b):
    return (a + b - 1) // b


def mlp_kernel(x_ref, wp_ref, bp_ref, o_ref):
    # x arrives as f32 straight from HBM; cast to bf16 in-VMEM for the MXU.
    x = x_ref[...].astype(jnp.bfloat16)                    # (TB, 26) bf16

    # Parameter slices out of the VMEM-resident packed slabs.
    # fc1 weights: tile-row-aligned 32-row load, then a value slice to 26 rows
    # (slab rows 26:31 are zero, so this is exact).
    w1 = wp_ref[W1_ROW:W1_ROW + 32, 0:H1][:IN_DIM, :]      # (26, 64) bf16
    w2 = wp_ref[W2_ROW:W2_ROW + H1, 0:H2]                  # (64, 32) bf16
    w3 = wp_ref[W3_ROW:W3_ROW + H2, 0:NUM_CLASSES]         # (32, 4)  bf16
    b1 = bp_ref[0:1, 0:H1]                                 # (1, 64)  f32
    b2 = bp_ref[1:2, 0:H2]                                 # (1, 32)  f32
    b3 = bp_ref[2:3, 0:NUM_CLASSES]                        # (1, 4)   f32

    # fc1 + ReLU  (bf16 MXU inputs, f32 accumulate / bias / ReLU)
    h = jnp.dot(x, w1, preferred_element_type=jnp.float32) + b1
    h = jnp.maximum(h, 0.0)
    # fc2 + ReLU
    h = jnp.dot(h.astype(jnp.bfloat16), w2,
                preferred_element_type=jnp.float32) + b2
    h = jnp.maximum(h, 0.0)
    # fc3 (logits, no activation)
    out = jnp.dot(h.astype(jnp.bfloat16), w3,
                  preferred_element_type=jnp.float32) + b3
    o_ref[...] = out.astype(o_ref.dtype)


def _pack_params(w1, b1, w2, b2, w3, b3):
    """Pack all layer parameters into one bf16 weight slab + one f32 bias slab."""
    wp = jnp.zeros((128, 128), jnp.bfloat16)
    wp = wp.at[W1_ROW:W1_ROW + IN_DIM, 0:H1].set(w1.astype(jnp.bfloat16))
    wp = wp.at[W2_ROW:W2_ROW + H1, 0:H2].set(w2.astype(jnp.bfloat16))
    wp = wp.at[W3_ROW:W3_ROW + H2, 0:NUM_CLASSES].set(w3.astype(jnp.bfloat16))

    bp = jnp.zeros((8, 128), jnp.float32)
    bp = bp.at[0, 0:H1].set(b1.reshape(-1).astype(jnp.float32))
    bp = bp.at[1, 0:H2].set(b2.reshape(-1).astype(jnp.float32))
    bp = bp.at[2, 0:NUM_CLASSES].set(b3.reshape(-1).astype(jnp.float32))
    return wp, bp


def _choose_tile(B, block_rows, min_steps=2):
    """Batch-tile rows: multiple of 8, capped at block_rows, and small enough
    that large batches get >= min_steps grid steps (so v7x's two TensorCores
    both receive work under dimension_semantics=('parallel',))."""
    tb_cap = max(8, _round_up(block_rows, 8))
    if B <= 8 * min_steps:
        return min(tb_cap, _round_up(B, 8))
    return min(tb_cap, _round_up(_cdiv(B, min_steps), 8))


def mlp_forward(x, w1, b1, w2, b2, w3, b3, *, block_rows=8192):
    """Forward pass.  Weights are (in, out); y = relu(relu(x@W1+b1)@W2+b2)@W3+b3.

    x may be float32 (recommended: passed through untouched) or bfloat16.
    """
    B = x.shape[0]
    wp, bp = _pack_params(w1, b1, w2, b2, w3, b3)

    tb = _choose_tile(B, block_rows)
    grid = (_cdiv(B, tb),)   # ragged tail handled by Pallas edge-block masking

    x_row_bytes = x.dtype.itemsize * IN_DIM
    cost = pl.CostEstimate(
        flops=B * FLOPS_PER_ROW,
        transcendentals=0,
        bytes_accessed=B * (x_row_bytes + NUM_CLASSES * 4)
        + wp.size * wp.dtype.itemsize + bp.size * bp.dtype.itemsize,
    )

    out = pl.pallas_call(
        mlp_kernel,
        out_shape=jax.ShapeDtypeStruct((B, NUM_CLASSES), jnp.float32),
        grid=grid,
        in_specs=[
            # x: tiled over the batch axis, raw dtype from HBM (cast in-kernel).
            pl.BlockSpec((tb, IN_DIM), lambda i: (i, 0)),
            # Packed params: constant block index -> VMEM-resident, DMA'd once.
            pl.BlockSpec((128, 128), lambda i: (0, 0)),
            pl.BlockSpec((8, 128), lambda i: (0, 0)),
        ],
        out_specs=pl.BlockSpec((tb, NUM_CLASSES), lambda i: (i, 0)),
        compiler_params=pltpu.CompilerParams(
            dimension_semantics=("parallel",),
            vmem_limit_bytes=56 * 1024 * 1024,
        ),
        cost_estimate=cost,
    )(x, wp, bp)
    return out


def init_linear(key, fan_in, fan_out):
    """Deterministic init mimicking PyTorch nn.Linear defaults (U[-1/sqrt(fan_in), +])."""
    kw, kb = jax.random.split(key)
    bound = 1.0 / jnp.sqrt(float(fan_in))
    # Stored as (in, out) so the kernel computes x @ W directly
    # (equivalent to PyTorch's x @ W_pt.T with W_pt of shape (out, in)).
    w = jax.random.uniform(kw, (fan_in, fan_out), jnp.float32, -bound, bound)
    b = jax.random.uniform(kb, (fan_out,), jnp.float32, -bound, bound)
    return w, b


def ref_forward_bf16(x, w1, b1, w2, b2, w3, b3):
    """Plain-JAX reference with the same bf16-matmul / f32-accumulate recipe."""
    xb = x.astype(jnp.bfloat16)
    w1b, w2b, w3b = (w.astype(jnp.bfloat16) for w in (w1, w2, w3))
    h = jnp.dot(xb, w1b, preferred_element_type=jnp.float32) + b1[None, :]
    h = jnp.maximum(h, 0.0)
    h = jnp.dot(h.astype(jnp.bfloat16), w2b,
                preferred_element_type=jnp.float32) + b2[None, :]
    h = jnp.maximum(h, 0.0)
    return jnp.dot(h.astype(jnp.bfloat16), w3b,
                   preferred_element_type=jnp.float32) + b3[None, :]


def ref_forward_f32(x, w1, b1, w2, b2, w3, b3):
    """Full-f32 reference matching the PyTorch module's numerics."""
    h = jnp.maximum(x @ w1 + b1[None, :], 0.0)
    h = jnp.maximum(h @ w2 + b2[None, :], 0.0)
    return h @ w3 + b3[None, :]


if __name__ == "__main__":
    key = jax.random.PRNGKey(0)
    kx, k1, k2, k3 = jax.random.split(key, 4)

    w1, b1 = init_linear(k1, IN_DIM, H1)
    w2, b2 = init_linear(k2, H1, H2)
    w3, b3 = init_linear(k3, H2, NUM_CLASSES)

    # 1) Small demo batch with block_rows=16 -> 4 "parallel" batch tiles so the
    #    pipelined multi-step grid path is exercised even at this size.
    B = 64
    x = jax.random.normal(kx, (B, IN_DIM), jnp.float32)
    out = mlp_forward(x, w1, b1, w2, b2, w3, b3, block_rows=16)
    jax.block_until_ready(out)
    ref = ref_forward_bf16(x, w1, b1, w2, b2, w3, b3)
    ref32 = ref_forward_f32(x, w1, b1, w2, b2, w3, b3)
    assert out.shape == (B, NUM_CLASSES)
    assert jnp.allclose(out, ref, atol=2e-2, rtol=2e-2), float(
        jnp.max(jnp.abs(out - ref)))
    # Fidelity to the f32 PyTorch forward (bf16 MXU inputs -> ~1e-2 level).
    assert jnp.allclose(out, ref32, atol=1e-1, rtol=1e-1), float(
        jnp.max(jnp.abs(out - ref32)))

    # 2) Ragged batch with a partial edge block on a multi-step grid
    #    (exercises Pallas edge-block padding + OOB write dropping).
    B2 = 50
    x2 = jax.random.normal(kx, (B2, IN_DIM), jnp.float32)
    out2 = mlp_forward(x2, w1, b1, w2, b2, w3, b3, block_rows=16)
    jax.block_until_ready(out2)
    ref2 = ref_forward_bf16(x2, w1, b1, w2, b2, w3, b3)
    assert out2.shape == (B2, NUM_CLASSES)
    assert jnp.allclose(out2, ref2, atol=2e-2, rtol=2e-2)

    # 3) Tiny ragged batch with the production default tile size
    #    (single partial block, B < tb).
    B3 = 10
    x3 = jax.random.normal(kx, (B3, IN_DIM), jnp.float32)
    out3 = mlp_forward(x3, w1, b1, w2, b2, w3, b3)
    jax.block_until_ready(out3)
    ref3 = ref_forward_bf16(x3, w1, b1, w2, b2, w3, b3)
    assert out3.shape == (B3, NUM_CLASSES)
    assert jnp.allclose(out3, ref3, atol=2e-2, rtol=2e-2)

    print("KERNEL_OK")
</pallas_src>

<mosaic_0001>
module attributes {stable_mosaic.version = 11 : i64} {
  func.func @mlp_kernel(%arg0: i32, %arg1: memref<16x26xf32, #tpu.memory_space<vmem>>, %arg2: memref<128x128xbf16, #tpu.memory_space<vmem>>, %arg3: memref<8x128xf32, #tpu.memory_space<vmem>>, %arg4: memref<16x4xf32, #tpu.memory_space<vmem>>) attributes {dimension_semantics = [#tpu.dimension_semantics<parallel>], iteration_bounds = array<i64: 4>, scalar_prefetch = 0 : i64, scratch_operands = 0 : i64, tpu.core_type = #tpu.core_type<tc>, window_params = [{transform_indices = @transform_0, window_bounds = array<i64: 16, 26>}, {pipeline_mode = #tpu.pipeline_mode<synchronous>, transform_indices = @transform_1, window_bounds = array<i64: 128, 128>}, {pipeline_mode = #tpu.pipeline_mode<synchronous>, transform_indices = @transform_2, window_bounds = array<i64: 8, 128>}, {transform_indices = @transform_3, window_bounds = array<i64: 16, 4>}]} {
    %c0 = arith.constant 0 : index
    %c0_0 = arith.constant 0 : index
    %0 = vector.load %arg1[%c0, %c0_0] : memref<16x26xf32, #tpu.memory_space<vmem>>, vector<16x26xf32>
    %1 = arith.truncf %0 : vector<16x26xf32> to vector<16x26xbf16>
    %c0_1 = arith.constant 0 : index
    %c0_2 = arith.constant 0 : index
    %2 = vector.load %arg2[%c0_1, %c0_2] : memref<128x128xbf16, #tpu.memory_space<vmem>>, vector<32x64xbf16>
    %3 = vector.extract_strided_slice %2 {offsets = [0, 0], sizes = [26, 64], strides = [1, 1]} : vector<32x64xbf16> to vector<26x64xbf16>
    %c32 = arith.constant 32 : index
    %c0_3 = arith.constant 0 : index
    %4 = vector.load %arg2[%c32, %c0_3] : memref<128x128xbf16, #tpu.memory_space<vmem>>, vector<64x32xbf16>
    %c96 = arith.constant 96 : index
    %c0_4 = arith.constant 0 : index
    %5 = vector.load %arg2[%c96, %c0_4] : memref<128x128xbf16, #tpu.memory_space<vmem>>, vector<32x4xbf16>
    %c0_5 = arith.constant 0 : index
    %c0_6 = arith.constant 0 : index
    %6 = vector.load %arg3[%c0_5, %c0_6] : memref<8x128xf32, #tpu.memory_space<vmem>>, vector<1x64xf32>
    %c1 = arith.constant 1 : index
    %c0_7 = arith.constant 0 : index
    %7 = vector.load %arg3[%c1, %c0_7] : memref<8x128xf32, #tpu.memory_space<vmem>>, vector<1x32xf32>
    %c2 = arith.constant 2 : index
    %c0_8 = arith.constant 0 : index
    %8 = vector.load %arg3[%c2, %c0_8] : memref<8x128xf32, #tpu.memory_space<vmem>>, vector<1x4xf32>
    %cst = arith.constant dense<0.000000e+00> : vector<16x64xf32>
    %9 = tpu.matmul %1, %3, %cst {dimension_numbers = #tpu.dot_dimension_numbers<[1], [0], [0], [1], [0, 0, 1, 1], [], []>} : vector<16x26xbf16>, vector<26x64xbf16>, vector<16x64xf32> -> vector<16x64xf32>
    %10 = vector.broadcast %6 : vector<1x64xf32> to vector<16x64xf32>
    %11 = arith.addf %9, %10 : vector<16x64xf32>
    %cst_9 = arith.constant 0.000000e+00 : f32
    %12 = vector.broadcast %cst_9 : f32 to vector<16x64xf32>
    %13 = arith.maximumf %11, %12 : vector<16x64xf32>
    %14 = arith.truncf %13 : vector<16x64xf32> to vector<16x64xbf16>
    %cst_10 = arith.constant dense<0.000000e+00> : vector<16x32xf32>
    %15 = tpu.matmul %14, %4, %cst_10 {dimension_numbers = #tpu.dot_dimension_numbers<[1], [0], [0], [1], [0, 0, 1, 1], [], []>} : vector<16x64xbf16>, vector<64x32xbf16>, vector<16x32xf32> -> vector<16x32xf32>
    %16 = vector.broadcast %7 : vector<1x32xf32> to vector<16x32xf32>
    %17 = arith.addf %15, %16 : vector<16x32xf32>
    %cst_11 = arith.constant 0.000000e+00 : f32
    %18 = vector.broadcast %cst_11 : f32 to vector<16x32xf32>
    %19 = arith.maximumf %17, %18 : vector<16x32xf32>
    %20 = arith.truncf %19 : vector<16x32xf32> to vector<16x32xbf16>
    %cst_12 = arith.constant dense<0.000000e+00> : vector<16x4xf32>
    %21 = tpu.matmul %20, %5, %cst_12 {dimension_numbers = #tpu.dot_dimension_numbers<[1], [0], [0], [1], [0, 0, 1, 1], [], []>} : vector<16x32xbf16>, vector<32x4xbf16>, vector<16x4xf32> -> vector<16x4xf32>
    %22 = vector.broadcast %8 : vector<1x4xf32> to vector<16x4xf32>
    %23 = arith.addf %21, %22 : vector<16x4xf32>
    %c0_13 = arith.constant 0 : index
    %c0_14 = arith.constant 0 : index
    %24 = vector.load %arg4[%c0_13, %c0_14] : memref<16x4xf32, #tpu.memory_space<vmem>>, vector<16x4xf32>
    tpu.vector_store %arg4[%c0_13, %c0_14], %23 {strides = array<i32>} : memref<16x4xf32, #tpu.memory_space<vmem>>, vector<16x4xf32>,
    return
  }
  func.func @transform_0(%arg0: i32) -> (i32, i32) {
    %c0_i32 = arith.constant 0 : i32
    %c0_i32_0 = arith.constant 0 : i32
    return %arg0, %c0_i32 : i32, i32
  }
  func.func @transform_1(%arg0: i32) -> (i32, i32) {
    %c0_i32 = arith.constant 0 : i32
    %c0_i32_0 = arith.constant 0 : i32
    %c0_i32_1 = arith.constant 0 : i32
    return %c0_i32, %c0_i32_0 : i32, i32
  }
  func.func @transform_2(%arg0: i32) -> (i32, i32) {
    %c0_i32 = arith.constant 0 : i32
    %c0_i32_0 = arith.constant 0 : i32
    %c0_i32_1 = arith.constant 0 : i32
    return %c0_i32, %c0_i32_0 : i32, i32
  }
  func.func @transform_3(%arg0: i32) -> (i32, i32) {
    %c0_i32 = arith.constant 0 : i32
    %c0_i32_0 = arith.constant 0 : i32
    return %arg0, %c0_i32 : i32, i32
  }
}

</mosaic_0001>

<bundles_post_ra>
// kernel: tpu_custom_call.1
= control target key start
LH: loop header
LB: loop body
LE: loop exit
PB: predicated region body
PF: predicated region fallthrough
CT: control target
= control target key end

     0   :  { %s572_s12 = smov 0   ;;  %s632_s0 = inlined_call_operand.vmem [shape: f32[64,26], index: 0, kind: input, shape index: {}]   ;;  %s633_s1 = inlined_call_operand.vmem [shape: bf16[128,128], index: 1, kind: input, shape index: {}]   ;;  %s634_s2 = inlined_call_operand.vmem [shape: f32[8,128], index: 2, kind: input, shape index: {}]   ;;  %s635_s3 = inlined_call_operand.vmem [shape: f32[64,4], index: 3, kind: output, shape index: {}]  }
   0x1 LB: > { %s460_s13 = sadd.s32 4294967295, %s548_s12   ;;  %p464_p0 = scmp.ge.s32.totalorder %s548_s12, 1  ;;  %s548_s12 = sphi %s572_s12, %s13_s12  }
   0x2   : > { %p138_p1 = scmp.lt.s32.totalorder %s548_s12, 5 }
   0x4   : > { %p139_p2 = pnand %p464_p0, %p138_p1 }
   0x5   : > { %v534_v0 = vld [vmem:[%s633_s1] sm:$0xff] (!%p139_p2)   ;;  %v550_v1 = vmov (!%p139_p2), 0.0   ;;  %v535_v2 = vld [vmem:[%s633_s1 + $0x8] sm:$0xff] (!%p139_p2)   ;;  %vm216_vm0 = vcmask (!%p139_p2), 1044480   ;;  %s465_s18 = sshll.u32 (!%p139_p2), %s460_s13, 1  ;;  %v536_v3 = vld [vmem:[%s633_s1 + $0x10] sm:$0xff] (!%p139_p2)  }
   0x6   : > { %142 = sbr.rel (%p139_p2) target bundleno = 676 (0x2a4), region = 32  ;;  %496 = vmatprep.subr.bf16.mxu0 (!%p139_p2), %v550_v1  ;;  %504 = vmatprep.subr.bf16.mxu1 (!%p139_p2), %v550_v1  ;;  %v218_v4 = vsel (!%p139_p2), %vm216_vm0, %v535_v2, 0  ;;  %vm551_vm1 = vmmov (!%p139_p2), 0   ;;  %p163_p3 = scmp.lt.s32.totalorder (!%p139_p2), %s465_s18, 7  ;;  %v537_v5 = vld [vmem:[%s633_s1 + $0x18] sm:$0xff] (!%p139_p2)   ;;  %vm212_vm2 = vcmask (!%p139_p2), 211968  }
   0x7   : > { %497 = vmatpush3.bf16.msra.mxu0 (!%p139_p2), %v534_v0  ;;  %500 = vmatprep.mubr.msk.bf16.mxu0 (!%p139_p2), %vm551_vm1, %v550_v1  ;;  %v538_v9 = vld [vmem:[%s633_s1 + $0x20] sm:$0xff] (!%p139_p2)   ;;  %v539_v10 = vld [vmem:[%s633_s1 + $0x28] sm:$0xff] (!%p139_p2)   ;;  %vm292_vm3 = vcmask (!%p139_p2), 523264   ;;  %v540_v21 = vld [vmem:[%s633_s1 + $0x30] sm:$0xff] (!%p139_p2)   ;;  %vm356_vm4 = vcmask (!%p139_p2), 261120   ;;  %vm401_vm5 = vcmask (!%p139_p2), 31744  }
   0x8   : > { %498 = vmatprep.subr.bf16.mxu0 (!%p139_p2), %v550_v1  ;;  %505 = vmatpush3.bf16.msra.mxu1 (!%p139_p2), %v536_v3  ;;  %v469_v11 = vld [vmem:[%s634_s2] ss:$0 sm:$0xff] (!%p139_p2)  ;;  %v541_v22 = vld [vmem:[%s633_s1 + $0x38] sm:$0xff] (!%p139_p2)   ;;  %v473_v23 = vld [vmem:[%s634_s2 + $0x1] ss:$0 sm:$0xff] (!%p139_p2) }
   0x9   : > { %512 = vmatprep.mubr.msk.bf16.mxu1 (!%p139_p2), %vm551_vm1, %v550_v1  ;;  %506 = vmatprep.subr.bf16.mxu1 (!%p139_p2), %v550_v1  ;;  %v479_v33 = vld [vmem:[%s634_s2 + $0x2] ss:$0 sm:$0xff] (!%p139_p2) }
   0xb   : > { %499 = vmatpush3.bf16.msra.mxu0 (!%p139_p2), %v218_v4 }
   0xc   : > { %516 = vmatprep.subr.bf16.mxu0 (!%p139_p2), %v550_v1  ;;  %507 = vmatpush3.bf16.msra.mxu1 (!%p139_p2), %v537_v5 }
   0xd   : > { %s637_s18 = smov (!%p163_p3, %s465_s18), 7  ;;  %508 = vmatprep.subr.bf16.mxu1 %v550_v1 }
   0xe   : > { %s466_s23 = sshll.u32 %s637_s18, 3 }
   0xf   : > { %s166_s26 = scalar_lea.vmem %s632_s0, %s466_s23  ;;  %s172_s17 = scalar_lea.vmem %s635_s3, %s466_s23 }
  0x10   : > { %v175_v6 = vld [vmem:[%s166_s26] sm:$0xff]  ;;  %v176_v7 = vld [vmem:[%s166_s26 + $0x8] sm:$0xff]  ;;  %509 = vmatpush3.bf16.msra.mxu1 %v538_v9 }
  0x11   : > { %v177_v8 = vpack.c.bf16 %v176_v7, %v175_v6  ;;  %510 = vmatprep.subr.bf16.mxu1 %v550_v1 }
  0x13   : > { %501 = vmatmul.mubr.msk.bf16.vlgmr.msra.gmra.mrb[0].mxu0 %vm212_vm2, %v177_v8 }
  0x14   : > { %520 = vmatprep.mubr.msk.bf16.mxu0 %vm551_vm1, %v550_v1  ;;  %511 = vmatpush3.bf16.msra.mxu1 %v539_v10 }
  0x15   : > { %517 = vmatpush3.bf16.msra.mxu0 %v540_v21 }
  0x16   : > { %518 = vmatprep.subr.bf16.mxu0 %v550_v1 }
  0x19   : > { %519 = vmatpush3.bf16.msra.mxu0 %v541_v22 }
  0xe6   : > { %v254_v12 = vpop.f32.mrb[0].mxu0 }
  0xe7   : > { %v255_v13 = vadd.f32 %v469_v11, %v254_v12  ;;  %v502_v14 = vpop.f32.mrb[1].mxu0 }
  0xe8   : > { %v257_v15 = vpop.f32.mrb[2].mxu0 }
  0xe9   : > { %v258_v16 = vadd.f32 %v469_v11, %v257_v15  ;;  %v503_v17 = vpop.f32.mrb[3].mxu0  ;;  %v261_v18 = vmax.f32 %v255_v13, 0.0 }
  0xeb   : > { %v262_v19 = vmax.f32 %v258_v16, 0.0 }
  0xed   : > { %v263_v20 = vpack.c.bf16 %v262_v19, %v261_v18 }
  0xef   : > { %513 = vmatmul.mubr.msk.bf16.vlgmr.msra.gmra.mrb[0].mxu1 %vm292_vm3, %v263_v20 }
 0x1c2   : > { %v330_v24 = vpop.f32.mrb[0].mxu1 }
 0x1c3   : > { %v331_v25 = vadd.f32 %v473_v23, %v330_v24  ;;  %v514_v26 = vpop.f32.mrb[1].mxu1 }
 0x1c4   : > { %v333_v27 = vpop.f32.mrb[2].mxu1 }
 0x1c5   : > { %v334_v28 = vadd.f32 %v473_v23, %v333_v27  ;;  %v515_v29 = vpop.f32.mrb[3].mxu1  ;;  %v337_v30 = vmax.f32 %v331_v25, 0.0 }
 0x1c7   : > { %v338_v31 = vmax.f32 %v334_v28, 0.0 }
 0x1c9   : > { %v339_v32 = vpack.c.bf16 %v338_v31, %v337_v30 }
 0x1cb   : > { %521 = vmatmul.mubr.msk.bf16.vlgmr.msra.gmra.mrb[4].mxu0 %vm356_vm4, %v339_v32 }
 0x29e   : > { %v394_v34 = vpop.f32.mrb[4].mxu0 }
 0x29f   : > { %v395_v35 = vadd.f32 %v479_v33, %v394_v34  ;;  %v522_v36 = vpop.f32.mrb[5].mxu0 }
 0x2a0   : > { %v397_v37 = vpop.f32.mrb[6].mxu0 }
 0x2a1   : > { %402 = vst.msk [vmem:[%s172_s17] sm:$0xff] %vm401_vm5, %v395_v35  ;;  %v398_v38 = vadd.f32 %v479_v33, %v397_v37  ;;  %v523_v39 = vpop.f32.mrb[7].mxu0 }
 0x2a3   : > { %403 = vst.msk [vmem:[%s172_s17 + $0x8] sm:$0xff] %vm401_vm5, %v398_v38 }
 0x2a4 PF: > { %s13_s12 = sadd.s32 1, %s548_s12  }
 0x2a5   : > { %p10_p4 = scmp.ge.s32.totalorder %s13_s12, 6  }
 0x2a7   :  { %12 = sbr.rel (!%p10_p4) target bundleno = 1 (0x1), region = 62 }

</bundles_post_ra>
